<compile_context>
chip_gen: v5e
topology: v5e:2x2
jax: 0.10.0
libtpu: 0.0.40
codegen_flags: <defaults>
</compile_context>

<pallas_src>
import math

import numpy as np
import jax
import jax.numpy as jnp
from jax import lax
from jax.experimental import pallas as pl
from jax.experimental.pallas import tpu as pltpu

LOG_STD_MAX = 2.0
LOG_STD_MIN = -20.0
EPS = 1e-6  # matches the (undefined-in-snippet) EPS used for the tanh correction
HALF_LOG_2PI = 0.5 * math.log(2.0 * math.pi)

OUT_W = 128     # lane-dense output slab width: pi in [:, :17], logp in [:, 17:18]
HEAD_W = 256    # fused mu|log_std head width: mu at lanes 0:17, log_std at lanes 128:145
SIDE_W = 256    # packed side input: w3_w*wa+b3 at lanes 0:16, eps at lanes 128:145


def _round_up(x, m):
    return (x + m - 1) // m * m


def _cdiv(a, b):
    return -(-a // b)


# ----------------------------------------------------------------------------- kernel
def _make_kernel(A, D):
    """Kernel over one (bt, ...) batch block; all feature dims are Python constants."""

    def kernel(x_ref, side_ref, w1_ref, w2_ref, w3_ref,
               ha_ref, hc_ref, hb_ref, b1_ref, b2_ref, out_ref):
        x = x_ref[...]                       # (bt, C*A*W)  x in its native flattened layout
        wa_b3 = side_ref[:, 0:A]             # (bt, A)      = w3_w * prev_asset_weights + conv3_b
        eps = side_ref[:, 128:128 + D]       # (bt, D)      pre-sampled N(0,1) noise

        # conv1 (kernel (1,3)) + ReLU as one MXU matmul against the block-structured operator
        h1 = jnp.dot(x, w1_ref[...], preferred_element_type=jnp.float32) + b1_ref[...]
        h1 = jnp.maximum(h1, 0.0)
        # conv2 (kernel (1, W-2)) + ReLU: collapses the width axis -> (bt, A*20)
        h2 = jnp.dot(h1, w2_ref[...], preferred_element_type=jnp.float32) + b2_ref[...]
        h2 = jnp.maximum(h2, 0.0)
        # conv3 (1x1): feature part as a matmul; portfolio-weight channel + bias pre-folded
        s = jnp.dot(h2, w3_ref[...], preferred_element_type=jnp.float32) + wa_b3   # (bt, A)

        # softmax over [0 (cash), s] handled analytically (no lane concatenate)
        m = jnp.maximum(jnp.max(s, axis=-1, keepdims=True), 0.0)    # (bt, 1)
        e = jnp.exp(s - m)                                          # (bt, A)
        e0 = jnp.exp(-m)                                            # (bt, 1) cash term
        inv_den = pl.reciprocal(e0 + jnp.sum(e, axis=-1, keepdims=True), approx=True)
        p_assets = e * inv_den                                      # (bt, A)
        p0 = e0 * inv_den                                           # (bt, 1)

        # fused mu / log_std heads: one (bt, A) @ (A, HEAD_W) matmul + cash row + bias row
        heads = (jnp.dot(p_assets, ha_ref[...], preferred_element_type=jnp.float32)
                 + p0 * hc_ref[...] + hb_ref[...])                  # (bt, HEAD_W)
        mu = heads[:, 0:D]
        log_std = jnp.clip(heads[:, 128:128 + D], LOG_STD_MIN, LOG_STD_MAX)
        std = jnp.exp(log_std)

        # rsample: xs = mu + std * eps, tanh squash
        xs = mu + std * eps
        pi = jnp.tanh(xs)

        # Normal(mu, std).log_prob(xs) - log(1 - tanh(xs)^2 + EPS), summed over actions
        logp = -0.5 * eps * eps - log_std - HALF_LOG_2PI - jnp.log(1.0 - pi * pi + EPS)
        logp_sum = jnp.sum(logp, axis=-1, keepdims=True)            # (bt, 1)

        # shift to positive and renormalise to a valid allocation (exact divide)
        pi1 = pi + 1.0
        pi_norm = pi1 / jnp.sum(pi1, axis=-1, keepdims=True)

        # single contiguous store of the useful lanes; lanes D+1:128 stay uninitialised
        out_ref[:, 0:D + 1] = jnp.concatenate([pi_norm, logp_sum], axis=-1)

    return kernel


# ----------------------------------------------------------------------------- wrapper
def gaussian_actor_forward(x, w, eps, params, block_b=256):
    """x: (B, C, A, W) f32, w: (B, A+1) previous portfolio weights, eps: (B, A+1) N(0,1)."""
    B, C, A, W = x.shape
    D = A + 1
    assert D == 17, "heads are Linear(17, 17) as in the PyTorch module"
    Wc = W - 2
    F1, F2 = 2 * Wc, 20
    AF0, AF1, AF2 = A * C * W, A * F1, A * F2
    f32 = jnp.float32

    # ---- conv1 as a matmul in x's NATIVE layout (row = c*A*W + a*W + p; no x transpose) ----
    w1 = params["conv1_w"].reshape(2, C, 3).astype(f32)
    p_idx = jnp.arange(W)[:, None]
    j_idx = jnp.arange(Wc)[None, :]
    k = p_idx - j_idx
    valid = ((k >= 0) & (k < 3)).astype(f32)
    t_cpoj = (w1[:, :, jnp.clip(k, 0, 2)] * valid[None, None]).transpose(1, 2, 0, 3)  # (C,W,2,Wc)
    eye_a = jnp.eye(A, dtype=f32)
    # w1_big[c*A*W + a*W + p, a'*F1 + o*Wc + j] = delta(a,a') * w1[o, c, p-j] * [0 <= p-j < 3]
    w1_big = (t_cpoj[:, None, :, None, :, :] *
              eye_a[None, :, None, :, None, None]).reshape(AF0, AF1)

    w2 = params["conv2_w"].reshape(F2, 2, Wc).astype(f32)
    w2_eff = w2.transpose(1, 2, 0).reshape(F1, F2)                   # rows o*Wc+j, cols f
    w2_big = jnp.kron(eye_a, w2_eff)                                 # (AF1, AF2)

    w3 = params["conv3_w"].reshape(F2 + 1).astype(f32)
    w3_big = jnp.kron(eye_a, w3[:F2].reshape(F2, 1))                 # (AF2, A)
    w3_w = w3[F2]                                                    # portfolio-channel weight
    b3 = params["conv3_b"].astype(f32)[0]

    # per-layer bias rows (own arrays -> full-ref reads inside the kernel)
    b1_arr = jnp.tile(jnp.repeat(params["conv1_b"].astype(f32), Wc), A).reshape(1, AF1)
    b2_arr = jnp.tile(params["conv2_b"].astype(f32), A).reshape(1, AF2)

    # ---- fused mu | log_std heads, split on a 128-lane tile boundary ----
    mu_wT = params["mu_w"].T.astype(f32)       # (17 in, 17 out):  y = x @ W^T + b
    ls_wT = params["ls_w"].T.astype(f32)
    h_assets = jnp.zeros((A, HEAD_W), f32)
    h_assets = h_assets.at[:, 0:D].set(mu_wT[1:]).at[:, 128:128 + D].set(ls_wT[1:])
    h_cash = jnp.zeros((1, HEAD_W), f32)
    h_cash = h_cash.at[0, 0:D].set(mu_wT[0]).at[0, 128:128 + D].set(ls_wT[0])
    h_bias = jnp.zeros((1, HEAD_W), f32)
    h_bias = (h_bias.at[0, 0:D].set(params["mu_b"].astype(f32))
                    .at[0, 128:128 + D].set(params["ls_b"].astype(f32)))

    # guard the constant-operator footprint (w1_big is quadratic in A; double-buffered)
    const_bytes = 4 * (w1_big.size + w2_big.size + w3_big.size + h_assets.size
                       + h_cash.size + h_bias.size + b1_arr.size + b2_arr.size)
    assert 2 * const_bytes < 16 * 1024 * 1024, "conv-as-matmul operators would blow VMEM"

    # ---- per-step data: x is a FREE reshape; wa/eps packed into one lane-dense side input ----
    x_flat = x.astype(f32).reshape(B, AF0)
    side = jnp.zeros((B, SIDE_W), f32)
    side = side.at[:, 0:A].set(w3_w * w.astype(f32)[:, 1:] + b3)     # conv3 scalars pre-folded
    side = side.at[:, 128:128 + D].set(eps.astype(f32))

    # ---- batch tiling: balanced tiles, >=2 grid steps when B allows (v7x megacore) ----
    if B > 8:
        n_tiles = max(_cdiv(B, block_b), 2)
    else:
        n_tiles = 1
    bt = min(_round_up(_cdiv(B, n_tiles), 8), _round_up(block_b, 8))
    n_tiles = _cdiv(B, bt)
    b_pad = n_tiles * bt
    if b_pad != B:
        pad = ((0, b_pad - B), (0, 0))
        x_flat = jnp.pad(x_flat, pad)
        side = jnp.pad(side, pad)

    def batch_spec(cols):
        return pl.BlockSpec((bt, cols), lambda b: (b, 0))

    def const_spec(shape):
        return pl.BlockSpec(shape, lambda b: (0, 0))

    grid_spec = pltpu.PrefetchScalarGridSpec(
        num_scalar_prefetch=0,
        grid=(n_tiles,),
        in_specs=[
            batch_spec(AF0),              # x, natively flattened
            batch_spec(SIDE_W),           # packed (w3_w*wa + b3 | eps) side input
            const_spec((AF0, AF1)),       # conv1 as block-structured matmul
            const_spec((AF1, AF2)),       # conv2 as block-diagonal matmul
            const_spec((AF2, A)),         # conv3 feature part as block-diagonal matmul
            const_spec((A, HEAD_W)),      # fused head, asset rows
            const_spec((1, HEAD_W)),      # fused head, cash row
            const_spec((1, HEAD_W)),      # fused head, bias row
            const_spec((1, AF1)),         # conv1 bias row
            const_spec((1, AF2)),         # conv2 bias row
        ],
        out_specs=batch_spec(OUT_W),
    )

    out = pl.pallas_call(
        _make_kernel(A, D),
        out_shape=jax.ShapeDtypeStruct((b_pad, OUT_W), f32),
        grid_spec=grid_spec,
        compiler_params=pltpu.CompilerParams(dimension_semantics=("parallel",)),
    )(x_flat, side, w1_big, w2_big, w3_big, h_assets, h_cash, h_bias, b1_arr, b2_arr)

    out = out[:B]
    return out[:, :D], out[:, D:D + 1]


# ----------------------------------------------------------------------------- reference
def ref_forward(x, w, eps, params):
    """Pure-JAX mirror of the PyTorch forward (batched path, exploration + logprob)."""
    dn = ("NCHW", "OIHW", "NCHW")
    hp = lax.Precision.HIGHEST
    y = lax.conv_general_dilated(x, params["conv1_w"], (1, 1), "VALID",
                                 dimension_numbers=dn, precision=hp)
    y = jax.nn.relu(y + params["conv1_b"].reshape(1, 2, 1, 1))
    y = lax.conv_general_dilated(y, params["conv2_w"], (1, 1), "VALID",
                                 dimension_numbers=dn, precision=hp)
    y = jax.nn.relu(y + params["conv2_b"].reshape(1, 20, 1, 1))

    B = x.shape[0]
    w_assets = w[:, 1:]
    w_r = w_assets.reshape(B, 1, -1, 1)
    cat = jnp.concatenate([y, w_r], axis=1)
    y = lax.conv_general_dilated(cat, params["conv3_w"], (1, 1), "VALID",
                                 dimension_numbers=dn, precision=hp)
    y = (y + params["conv3_b"].reshape(1, 1, 1, 1)).reshape(B, -1)       # squeeze

    y = jnp.concatenate([jnp.zeros((B, 1), jnp.float32), y], axis=1)     # cash bias
    p = jax.nn.softmax(y, axis=1)

    mu = p @ params["mu_w"].T + params["mu_b"]
    log_std = jnp.clip(p @ params["ls_w"].T + params["ls_b"], LOG_STD_MIN, LOG_STD_MAX)
    std = jnp.exp(log_std)
    xs = mu + std * eps
    pi = jnp.tanh(xs)
    logp = (-0.5 * ((xs - mu) / std) ** 2 - log_std - 0.5 * jnp.log(2.0 * jnp.pi)
            - jnp.log(1.0 - pi ** 2 + EPS)).sum(axis=1, keepdims=True)
    pi1 = pi + 1.0
    return pi1 / pi1.sum(axis=1, keepdims=True), logp


# ----------------------------------------------------------------------------- params
def init_params(key, in_channels, window_length):
    ks = jax.random.split(key, 10)

    def uinit(k, shape, fan_in):
        bound = 1.0 / math.sqrt(fan_in)
        return jax.random.uniform(k, shape, jnp.float32, -bound, bound)

    return {
        "conv1_w": uinit(ks[0], (2, in_channels, 1, 3), in_channels * 3),
        "conv1_b": uinit(ks[1], (2,), in_channels * 3),
        "conv2_w": uinit(ks[2], (20, 2, 1, window_length - 2), 2 * (window_length - 2)),
        "conv2_b": uinit(ks[3], (20,), 2 * (window_length - 2)),
        "conv3_w": uinit(ks[4], (1, 21, 1, 1), 21),
        "conv3_b": uinit(ks[5], (1,), 21),
        "mu_w": uinit(ks[6], (17, 17), 17),
        "mu_b": uinit(ks[7], (17,), 17),
        "ls_w": uinit(ks[8], (17, 17), 17),
        "ls_b": uinit(ks[9], (17,), 17),
    }


# ----------------------------------------------------------------------------- main
if __name__ == "__main__":
    key = jax.random.PRNGKey(0)
    kx, kw, keps, kp = jax.random.split(key, 4)

    B, C, A, W = 2, 4, 16, 8        # batch, in_channels, assets (=16 -> 17 actions), window_length
    x = jax.random.normal(kx, (B, C, A, W), jnp.float32)
    w_raw = jax.random.uniform(kw, (B, A + 1), jnp.float32)
    w_port = w_raw / w_raw.sum(axis=1, keepdims=True)           # previous portfolio weights
    eps = jax.random.normal(keps, (B, A + 1), jnp.float32)      # rsample noise
    params = init_params(kp, C, W)

    pi_action, logp_pi = gaussian_actor_forward(x, w_port, eps, params)
    pi_action, logp_pi = jax.block_until_ready((pi_action, logp_pi))

    pi_ref, logp_ref = ref_forward(x, w_port, eps, params)
    np.testing.assert_allclose(np.asarray(pi_action), np.asarray(pi_ref), rtol=2e-3, atol=2e-3)
    np.testing.assert_allclose(np.asarray(logp_pi), np.asarray(logp_ref), rtol=2e-3, atol=5e-3)

    print("KERNEL_OK")
</pallas_src>

<mosaic_0001>
module attributes {stable_mosaic.version = 11 : i64} {
  func.func @kernel(%arg0: i32, %arg1: memref<8x512xf32, #tpu.memory_space<vmem>>, %arg2: memref<8x256xf32, #tpu.memory_space<vmem>>, %arg3: memref<512x192xf32, #tpu.memory_space<vmem>>, %arg4: memref<192x320xf32, #tpu.memory_space<vmem>>, %arg5: memref<320x16xf32, #tpu.memory_space<vmem>>, %arg6: memref<16x256xf32, #tpu.memory_space<vmem>>, %arg7: memref<1x256xf32, #tpu.memory_space<vmem>>, %arg8: memref<1x256xf32, #tpu.memory_space<vmem>>, %arg9: memref<1x192xf32, #tpu.memory_space<vmem>>, %arg10: memref<1x320xf32, #tpu.memory_space<vmem>>, %arg11: memref<8x128xf32, #tpu.memory_space<vmem>>) attributes {dimension_semantics = [#tpu.dimension_semantics<parallel>], iteration_bounds = array<i64: 1>, scalar_prefetch = 0 : i64, scratch_operands = 0 : i64, tpu.core_type = #tpu.core_type<tc>, window_params = [{transform_indices = @transform_0, window_bounds = array<i64: 8, 512>}, {transform_indices = @transform_1, window_bounds = array<i64: 8, 256>}, {pipeline_mode = #tpu.pipeline_mode<synchronous>, transform_indices = @transform_2, window_bounds = array<i64: 512, 192>}, {pipeline_mode = #tpu.pipeline_mode<synchronous>, transform_indices = @transform_3, window_bounds = array<i64: 192, 320>}, {pipeline_mode = #tpu.pipeline_mode<synchronous>, transform_indices = @transform_4, window_bounds = array<i64: 320, 16>}, {pipeline_mode = #tpu.pipeline_mode<synchronous>, transform_indices = @transform_5, window_bounds = array<i64: 16, 256>}, {pipeline_mode = #tpu.pipeline_mode<synchronous>, transform_indices = @transform_6, window_bounds = array<i64: 1, 256>}, {pipeline_mode = #tpu.pipeline_mode<synchronous>, transform_indices = @transform_7, window_bounds = array<i64: 1, 256>}, {pipeline_mode = #tpu.pipeline_mode<synchronous>, transform_indices = @transform_8, window_bounds = array<i64: 1, 192>}, {pipeline_mode = #tpu.pipeline_mode<synchronous>, transform_indices = @transform_9, window_bounds = array<i64: 1, 320>}, {transform_indices = @transform_10, window_bounds = array<i64: 8, 128>}]} {
    %c0 = arith.constant 0 : index
    %c0_0 = arith.constant 0 : index
    %0 = vector.load %arg1[%c0, %c0_0] : memref<8x512xf32, #tpu.memory_space<vmem>>, vector<8x512xf32>
    %c0_1 = arith.constant 0 : index
    %c0_2 = arith.constant 0 : index
    %1 = vector.load %arg2[%c0_1, %c0_2] : memref<8x256xf32, #tpu.memory_space<vmem>>, vector<8x16xf32>
    %c0_3 = arith.constant 0 : index
    %c128 = arith.constant 128 : index
    %2 = vector.load %arg2[%c0_3, %c128] : memref<8x256xf32, #tpu.memory_space<vmem>>, vector<8x17xf32>
    %c0_4 = arith.constant 0 : index
    %c0_5 = arith.constant 0 : index
    %3 = vector.load %arg3[%c0_4, %c0_5] : memref<512x192xf32, #tpu.memory_space<vmem>>, vector<512x192xf32>
    %cst = arith.constant dense<0.000000e+00> : vector<8x192xf32>
    %4 = tpu.matmul %0, %3, %cst {dimension_numbers = #tpu.dot_dimension_numbers<[1], [0], [0], [1], [0, 0, 1, 1], [], []>} : vector<8x512xf32>, vector<512x192xf32>, vector<8x192xf32> -> vector<8x192xf32>
    %c0_6 = arith.constant 0 : index
    %c0_7 = arith.constant 0 : index
    %5 = vector.load %arg9[%c0_6, %c0_7] : memref<1x192xf32, #tpu.memory_space<vmem>>, vector<1x192xf32>
    %6 = vector.broadcast %5 : vector<1x192xf32> to vector<8x192xf32>
    %7 = arith.addf %4, %6 : vector<8x192xf32>
    %cst_8 = arith.constant 0.000000e+00 : f32
    %8 = vector.broadcast %cst_8 : f32 to vector<8x192xf32>
    %9 = arith.maximumf %7, %8 : vector<8x192xf32>
    %c0_9 = arith.constant 0 : index
    %c0_10 = arith.constant 0 : index
    %10 = vector.load %arg4[%c0_9, %c0_10] : memref<192x320xf32, #tpu.memory_space<vmem>>, vector<192x320xf32>
    %cst_11 = arith.constant dense<0.000000e+00> : vector<8x320xf32>
    %11 = tpu.matmul %9, %10, %cst_11 {dimension_numbers = #tpu.dot_dimension_numbers<[1], [0], [0], [1], [0, 0, 1, 1], [], []>} : vector<8x192xf32>, vector<192x320xf32>, vector<8x320xf32> -> vector<8x320xf32>
    %c0_12 = arith.constant 0 : index
    %c0_13 = arith.constant 0 : index
    %12 = vector.load %arg10[%c0_12, %c0_13] : memref<1x320xf32, #tpu.memory_space<vmem>>, vector<1x320xf32>
    %13 = vector.broadcast %12 : vector<1x320xf32> to vector<8x320xf32>
    %14 = arith.addf %11, %13 : vector<8x320xf32>
    %cst_14 = arith.constant 0.000000e+00 : f32
    %15 = vector.broadcast %cst_14 : f32 to vector<8x320xf32>
    %16 = arith.maximumf %14, %15 : vector<8x320xf32>
    %c0_15 = arith.constant 0 : index
    %c0_16 = arith.constant 0 : index
    %17 = vector.load %arg5[%c0_15, %c0_16] : memref<320x16xf32, #tpu.memory_space<vmem>>, vector<320x16xf32>
    %cst_17 = arith.constant dense<0.000000e+00> : vector<8x16xf32>
    %18 = tpu.matmul %16, %17, %cst_17 {dimension_numbers = #tpu.dot_dimension_numbers<[1], [0], [0], [1], [0, 0, 1, 1], [], []>} : vector<8x320xf32>, vector<320x16xf32>, vector<8x16xf32> -> vector<8x16xf32>
    %19 = arith.addf %18, %1 : vector<8x16xf32>
    %cst_18 = arith.constant dense<0xFF800000> : vector<8xf32>
    %20 = vector.multi_reduction <maximumf>, %19, %cst_18 [1] : vector<8x16xf32> to vector<8xf32>
    %21 = vector.shape_cast %20 : vector<8xf32> to vector<8x1xf32>
    %cst_19 = arith.constant 0.000000e+00 : f32
    %22 = vector.broadcast %cst_19 : f32 to vector<8x1xf32>
    %23 = arith.maximumf %21, %22 : vector<8x1xf32>
    %24 = vector.broadcast %23 : vector<8x1xf32> to vector<8x16xf32>
    %25 = arith.subf %19, %24 : vector<8x16xf32>
    %26 = math.exp %25 : vector<8x16xf32>
    %cst_20 = arith.constant 0.000000e+00 : f32
    %27 = vector.broadcast %cst_20 : f32 to vector<8x1xf32>
    %28 = arith.subf %27, %23 : vector<8x1xf32>
    %29 = math.exp %28 : vector<8x1xf32>
    %cst_21 = arith.constant dense<0.000000e+00> : vector<8xf32>
    %30 = vector.multi_reduction <add>, %26, %cst_21 [1] : vector<8x16xf32> to vector<8xf32>
    %31 = vector.shape_cast %30 : vector<8xf32> to vector<8x1xf32>
    %32 = arith.addf %29, %31 : vector<8x1xf32>
    %33 = tpu.reciprocal %32 {approx = true} : vector<8x1xf32> -> vector<8x1xf32>
    %34 = vector.broadcast %33 : vector<8x1xf32> to vector<8x16xf32>
    %35 = arith.mulf %26, %34 : vector<8x16xf32>
    %36 = arith.mulf %29, %33 : vector<8x1xf32>
    %c0_22 = arith.constant 0 : index
    %c0_23 = arith.constant 0 : index
    %37 = vector.load %arg6[%c0_22, %c0_23] : memref<16x256xf32, #tpu.memory_space<vmem>>, vector<16x256xf32>
    %cst_24 = arith.constant dense<0.000000e+00> : vector<8x256xf32>
    %38 = tpu.matmul %35, %37, %cst_24 {dimension_numbers = #tpu.dot_dimension_numbers<[1], [0], [0], [1], [0, 0, 1, 1], [], []>} : vector<8x16xf32>, vector<16x256xf32>, vector<8x256xf32> -> vector<8x256xf32>
    %c0_25 = arith.constant 0 : index
    %c0_26 = arith.constant 0 : index
    %39 = vector.load %arg7[%c0_25, %c0_26] : memref<1x256xf32, #tpu.memory_space<vmem>>, vector<1x256xf32>
    %40 = vector.broadcast %36 : vector<8x1xf32> to vector<8x256xf32>
    %41 = vector.broadcast %39 : vector<1x256xf32> to vector<8x256xf32>
    %42 = arith.mulf %40, %41 : vector<8x256xf32>
    %43 = arith.addf %38, %42 : vector<8x256xf32>
    %c0_27 = arith.constant 0 : index
    %c0_28 = arith.constant 0 : index
    %44 = vector.load %arg8[%c0_27, %c0_28] : memref<1x256xf32, #tpu.memory_space<vmem>>, vector<1x256xf32>
    %45 = vector.broadcast %44 : vector<1x256xf32> to vector<8x256xf32>
    %46 = arith.addf %43, %45 : vector<8x256xf32>
    %47 = vector.extract_strided_slice %46 {offsets = [0, 0], sizes = [8, 17], strides = [1, 1]} : vector<8x256xf32> to vector<8x17xf32>
    %48 = vector.extract_strided_slice %46 {offsets = [0, 128], sizes = [8, 17], strides = [1, 1]} : vector<8x256xf32> to vector<8x17xf32>
    %cst_29 = arith.constant -2.000000e+01 : f32
    %cst_30 = arith.constant 2.000000e+00 : f32
    %49 = vector.broadcast %cst_29 : f32 to vector<8x17xf32>
    %50 = arith.maximumf %49, %48 : vector<8x17xf32>
    %51 = vector.broadcast %cst_30 : f32 to vector<8x17xf32>
    %52 = arith.minimumf %51, %50 : vector<8x17xf32>
    %53 = math.exp %52 : vector<8x17xf32>
    %54 = arith.mulf %53, %2 : vector<8x17xf32>
    %55 = arith.addf %47, %54 : vector<8x17xf32>
    %56 = math.tanh %55 : vector<8x17xf32>
    %cst_31 = arith.constant -5.000000e-01 : f32
    %57 = vector.broadcast %cst_31 : f32 to vector<8x17xf32>
    %58 = arith.mulf %57, %2 : vector<8x17xf32>
    %59 = arith.mulf %58, %2 : vector<8x17xf32>
    %60 = arith.subf %59, %52 : vector<8x17xf32>
    %cst_32 = arith.constant 0.918938517 : f32
    %61 = vector.broadcast %cst_32 : f32 to vector<8x17xf32>
    %62 = arith.subf %60, %61 : vector<8x17xf32>
    %63 = arith.mulf %56, %56 : vector<8x17xf32>
    %cst_33 = arith.constant 1.000000e+00 : f32
    %64 = vector.broadcast %cst_33 : f32 to vector<8x17xf32>
    %65 = arith.subf %64, %63 : vector<8x17xf32>
    %cst_34 = arith.constant 9.99999997E-7 : f32
    %66 = vector.broadcast %cst_34 : f32 to vector<8x17xf32>
    %67 = arith.addf %65, %66 : vector<8x17xf32>
    %68 = math.log %67 : vector<8x17xf32>
    %69 = arith.subf %62, %68 : vector<8x17xf32>
    %cst_35 = arith.constant dense<0.000000e+00> : vector<8xf32>
    %70 = vector.multi_reduction <add>, %69, %cst_35 [1] : vector<8x17xf32> to vector<8xf32>
    %71 = vector.shape_cast %70 : vector<8xf32> to vector<8x1xf32>
    %cst_36 = arith.constant 1.000000e+00 : f32
    %72 = vector.broadcast %cst_36 : f32 to vector<8x17xf32>
    %73 = arith.addf %56, %72 : vector<8x17xf32>
    %cst_37 = arith.constant dense<0.000000e+00> : vector<8xf32>
    %74 = vector.multi_reduction <add>, %73, %cst_37 [1] : vector<8x17xf32> to vector<8xf32>
    %75 = vector.shape_cast %74 : vector<8xf32> to vector<8x1xf32>
    %76 = vector.broadcast %75 : vector<8x1xf32> to vector<8x17xf32>
    %77 = arith.divf %73, %76 : vector<8x17xf32>
    %78 = tpu.concatenate %77, %71 in 1 : vector<8x17xf32>, vector<8x1xf32> -> vector<8x18xf32>
    %c0_38 = arith.constant 0 : index
    %c0_39 = arith.constant 0 : index
    %79 = vector.load %arg11[%c0_38, %c0_39] : memref<8x128xf32, #tpu.memory_space<vmem>>, vector<8x18xf32>
    tpu.vector_store %arg11[%c0_38, %c0_39], %78 {strides = array<i32>} : memref<8x128xf32, #tpu.memory_space<vmem>>, vector<8x18xf32>,
    return
  }
  func.func @transform_0(%arg0: i32) -> (i32, i32) {
    %c0_i32 = arith.constant 0 : i32
    %c0_i32_0 = arith.constant 0 : i32
    return %arg0, %c0_i32 : i32, i32
  }
  func.func @transform_1(%arg0: i32) -> (i32, i32) {
    %c0_i32 = arith.constant 0 : i32
    %c0_i32_0 = arith.constant 0 : i32
    return %arg0, %c0_i32 : i32, i32
  }
  func.func @transform_2(%arg0: i32) -> (i32, i32) {
    %c0_i32 = arith.constant 0 : i32
    %c0_i32_0 = arith.constant 0 : i32
    %c0_i32_1 = arith.constant 0 : i32
    return %c0_i32, %c0_i32_0 : i32, i32
  }
  func.func @transform_3(%arg0: i32) -> (i32, i32) {
    %c0_i32 = arith.constant 0 : i32
    %c0_i32_0 = arith.constant 0 : i32
    %c0_i32_1 = arith.constant 0 : i32
    return %c0_i32, %c0_i32_0 : i32, i32
  }
  func.func @transform_4(%arg0: i32) -> (i32, i32) {
    %c0_i32 = arith.constant 0 : i32
    %c0_i32_0 = arith.constant 0 : i32
    %c0_i32_1 = arith.constant 0 : i32
    return %c0_i32, %c0_i32_0 : i32, i32
  }
  func.func @transform_5(%arg0: i32) -> (i32, i32) {
    %c0_i32 = arith.constant 0 : i32
    %c0_i32_0 = arith.constant 0 : i32
    %c0_i32_1 = arith.constant 0 : i32
    return %c0_i32, %c0_i32_0 : i32, i32
  }
  func.func @transform_6(%arg0: i32) -> (i32, i32) {
    %c0_i32 = arith.constant 0 : i32
    %c0_i32_0 = arith.constant 0 : i32
    %c0_i32_1 = arith.constant 0 : i32
    return %c0_i32, %c0_i32_0 : i32, i32
  }
  func.func @transform_7(%arg0: i32) -> (i32, i32) {
    %c0_i32 = arith.constant 0 : i32
    %c0_i32_0 = arith.constant 0 : i32
    %c0_i32_1 = arith.constant 0 : i32
    return %c0_i32, %c0_i32_0 : i32, i32
  }
  func.func @transform_8(%arg0: i32) -> (i32, i32) {
    %c0_i32 = arith.constant 0 : i32
    %c0_i32_0 = arith.constant 0 : i32
    %c0_i32_1 = arith.constant 0 : i32
    return %c0_i32, %c0_i32_0 : i32, i32
  }
  func.func @transform_9(%arg0: i32) -> (i32, i32) {
    %c0_i32 = arith.constant 0 : i32
    %c0_i32_0 = arith.constant 0 : i32
    %c0_i32_1 = arith.constant 0 : i32
    return %c0_i32, %c0_i32_0 : i32, i32
  }
  func.func @transform_10(%arg0: i32) -> (i32, i32) {
    %c0_i32 = arith.constant 0 : i32
    %c0_i32_0 = arith.constant 0 : i32
    return %arg0, %c0_i32 : i32, i32
  }
}

</mosaic_0001>

<bundles_post_ra>
// kernel: tpu_custom_call.1
= control target key start
LH: loop header
LB: loop body
LE: loop exit
PB: predicated region body
PF: predicated region fallthrough
CT: control target
= control target key end

     0   :  { %s1668_s0 = inlined_call_operand.vmem [shape: f32[8,512], index: 0, kind: input, shape index: {}]   ;;  %s1669_s1 = inlined_call_operand.vmem [shape: f32[8,256], index: 1, kind: input, shape index: {}]   ;;  %s1670_s2 = inlined_call_operand.vmem [shape: f32[512,192], index: 2, kind: input, shape index: {}]   ;;  %s1671_s3 = inlined_call_operand.vmem [shape: f32[192,320], index: 3, kind: input, shape index: {}]   ;;  %s1672_s4 = inlined_call_operand.vmem [shape: f32[320,16], index: 4, kind: input, shape index: {}]   ;;  %s1673_s5 = inlined_call_operand.vmem [shape: f32[16,256], index: 5, kind: input, shape index: {}]   ;;  %s1674_s6 = inlined_call_operand.vmem [shape: f32[1,256], index: 6, kind: input, shape index: {}]   ;;  %s1675_s7 = inlined_call_operand.vmem [shape: f32[1,256], index: 7, kind: input, shape index: {}]   ;;  %s1676_s8 = inlined_call_operand.vmem [shape: f32[1,192], index: 8, kind: input, shape index: {}]   ;;  %s1677_s9 = inlined_call_operand.vmem [shape: f32[1,320], index: 9, kind: input, shape index: {}]   ;;  %s1678_s10 = inlined_call_operand.hbm [shape: f32[8,128], index: 10, kind: output, shape index: {}]  }
   0x1   :  { %v136_v0 = vld [vmem:[%s1670_s2 + $0x2f0] sm:$0xff]  ;;  %v134_v2 = vld [vmem:[%s1670_s2 + $0x2e0] sm:$0xff]  ;;  %v137_v62 = vld [vmem:[%s1670_s2 + $0x2f8] sm:$0xff] }
   0x2   :  { %v72_v1 = vld [vmem:[%s1670_s2 + $0xf0] sm:$0xff]  ;;  %216 = vmatpush.msra.mxu2 %v136_v0  ;;  %v70_v4 = vld [vmem:[%s1670_s2 + $0xe0] sm:$0xff]  ;;  %v73_v0 = vld [vmem:[%s1670_s2 + $0xf8] sm:$0xff] }
   0x3   :  { %176 = vmatpush.msra.mxu0 %v72_v1  ;;  %v168_v3 = vld [vmem:[%s1670_s2 + $0x3f0] sm:$0xff]  ;;  %v166_v7 = vld [vmem:[%s1670_s2 + $0x3e0] sm:$0xff]  ;;  %v169_v1 = vld [vmem:[%s1670_s2 + $0x3f8] sm:$0xff] }
   0x4   :  { %v104_v5 = vld [vmem:[%s1670_s2 + $0x1f0] sm:$0xff]  ;;  %236 = vmatpush.msra.mxu3 %v168_v3  ;;  %217 = vmatpush.msra.mxu2 %v134_v2  ;;  %v102_v9 = vld [vmem:[%s1670_s2 + $0x1e0] sm:$0xff]  ;;  %v135_v2 = vld [vmem:[%s1670_s2 + $0x2e8] sm:$0xff] }
   0x5   :  { %196 = vmatpush.msra.mxu1 %v104_v5  ;;  %v132_v6 = vld [vmem:[%s1670_s2 + $0x2d0] sm:$0xff]  ;;  %177 = vmatpush.msra.mxu0 %v70_v4  ;;  %v130_v11 = vld [vmem:[%s1670_s2 + $0x2c0] sm:$0xff]  ;;  %v71_v4 = vld [vmem:[%s1670_s2 + $0xe8] sm:$0xff] }
   0x6   :  { %v68_v8 = vld [vmem:[%s1670_s2 + $0xd0] sm:$0xff]  ;;  %237 = vmatpush.msra.mxu3 %v166_v7  ;;  %v66_v12 = vld [vmem:[%s1670_s2 + $0xc0] sm:$0xff]  ;;  %218 = vmatpush.msra.mxu2 %v132_v6  ;;  %v105_v5 = vld [vmem:[%s1670_s2 + $0x1f8] sm:$0xff] }
   0x7   :  { %v164_v10 = vld [vmem:[%s1670_s2 + $0x3d0] sm:$0xff]  ;;  %197 = vmatpush.msra.mxu1 %v102_v9  ;;  %178 = vmatpush.msra.mxu0 %v68_v8  ;;  %v162_v14 = vld [vmem:[%s1670_s2 + $0x3c0] sm:$0xff]  ;;  %v133_v6 = vld [vmem:[%s1670_s2 + $0x2d8] sm:$0xff] }
   0x8   :  { %v100_v13 = vld [vmem:[%s1670_s2 + $0x1d0] sm:$0xff]  ;;  %v98_v15 = vld [vmem:[%s1670_s2 + $0x1c0] sm:$0xff]  ;;  %238 = vmatpush.msra.mxu3 %v164_v10  ;;  %219 = vmatpush.msra.mxu2 %v130_v11  ;;  %v167_v7 = vld [vmem:[%s1670_s2 + $0x3e8] sm:$0xff] }
   0x9   :  { %198 = vmatpush.msra.mxu1 %v100_v13  ;;  %v128_v16 = vld [vmem:[%s1670_s2 + $0x2b0] sm:$0xff]  ;;  %179 = vmatpush.msra.mxu0 %v66_v12  ;;  %v126_v20 = vld [vmem:[%s1670_s2 + $0x2a0] sm:$0xff]  ;;  %v69_v8 = vld [vmem:[%s1670_s2 + $0xd8] sm:$0xff] }
   0xa   :  { %v64_v17 = vld [vmem:[%s1670_s2 + $0xb0] sm:$0xff]  ;;  %239 = vmatpush.msra.mxu3 %v162_v14  ;;  %v62_v21 = vld [vmem:[%s1670_s2 + $0xa0] sm:$0xff]  ;;  %220 = vmatpush.msra.mxu2 %v128_v16  ;;  %v103_v9 = vld [vmem:[%s1670_s2 + $0x1e8] sm:$0xff] }
   0xb   :  { %v160_v18 = vld [vmem:[%s1670_s2 + $0x3b0] sm:$0xff]  ;;  %199 = vmatpush.msra.mxu1 %v98_v15  ;;  %180 = vmatpush.msra.mxu0 %v64_v17  ;;  %v158_v22 = vld [vmem:[%s1670_s2 + $0x3a0] sm:$0xff]  ;;  %v131_v10 = vld [vmem:[%s1670_s2 + $0x2c8] sm:$0xff] }
   0xc   :  { %v96_v19 = vld [vmem:[%s1670_s2 + $0x1b0] sm:$0xff]  ;;  %v94_v23 = vld [vmem:[%s1670_s2 + $0x1a0] sm:$0xff]  ;;  %240 = vmatpush.msra.mxu3 %v160_v18  ;;  %221 = vmatpush.msra.mxu2 %v126_v20  ;;  %v165_v11 = vld [vmem:[%s1670_s2 + $0x3d8] sm:$0xff] }
   0xd   :  { %200 = vmatpush.msra.mxu1 %v96_v19  ;;  %v124_v24 = vld [vmem:[%s1670_s2 + $0x290] sm:$0xff]  ;;  %181 = vmatpush.msra.mxu0 %v62_v21  ;;  %v122_v28 = vld [vmem:[%s1670_s2 + $0x280] sm:$0xff]  ;;  %v67_v12 = vld [vmem:[%s1670_s2 + $0xc8] sm:$0xff] }
   0xe   :  { %v60_v25 = vld [vmem:[%s1670_s2 + $0x90] sm:$0xff]  ;;  %241 = vmatpush.msra.mxu3 %v158_v22  ;;  %v58_v29 = vld [vmem:[%s1670_s2 + $0x80] sm:$0xff]  ;;  %222 = vmatpush.msra.mxu2 %v124_v24  ;;  %v101_v13 = vld [vmem:[%s1670_s2 + $0x1d8] sm:$0xff] }
   0xf   :  { %v156_v26 = vld [vmem:[%s1670_s2 + $0x390] sm:$0xff]  ;;  %201 = vmatpush.msra.mxu1 %v94_v23  ;;  %182 = vmatpush.msra.mxu0 %v60_v25  ;;  %v154_v30 = vld [vmem:[%s1670_s2 + $0x380] sm:$0xff]  ;;  %v129_v14 = vld [vmem:[%s1670_s2 + $0x2b8] sm:$0xff] }
  0x10   :  { %v92_v27 = vld [vmem:[%s1670_s2 + $0x190] sm:$0xff]  ;;  %v90_v31 = vld [vmem:[%s1670_s2 + $0x180] sm:$0xff]  ;;  %242 = vmatpush.msra.mxu3 %v156_v26  ;;  %223 = vmatpush.msra.mxu2 %v122_v28  ;;  %v163_v15 = vld [vmem:[%s1670_s2 + $0x3c8] sm:$0xff] }
  0x11   :  { %202 = vmatpush.msra.mxu1 %v92_v27  ;;  %v120_v32 = vld [vmem:[%s1670_s2 + $0x270] sm:$0xff]  ;;  %183 = vmatpush.msra.mxu0 %v58_v29  ;;  %v118_v36 = vld [vmem:[%s1670_s2 + $0x260] sm:$0xff]  ;;  %v65_v16 = vld [vmem:[%s1670_s2 + $0xb8] sm:$0xff] }
  0x12   :  { %v56_v33 = vld [vmem:[%s1670_s2 + $0x70] sm:$0xff]  ;;  %243 = vmatpush.msra.mxu3 %v154_v30  ;;  %v54_v37 = vld [vmem:[%s1670_s2 + $0x60] sm:$0xff]  ;;  %224 = vmatpush.msra.mxu2 %v120_v32  ;;  %v99_v17 = vld [vmem:[%s1670_s2 + $0x1c8] sm:$0xff] }
  0x13   :  { %v152_v34 = vld [vmem:[%s1670_s2 + $0x370] sm:$0xff]  ;;  %203 = vmatpush.msra.mxu1 %v90_v31  ;;  %184 = vmatpush.msra.mxu0 %v56_v33  ;;  %v150_v38 = vld [vmem:[%s1670_s2 + $0x360] sm:$0xff]  ;;  %v127_v18 = vld [vmem:[%s1670_s2 + $0x2a8] sm:$0xff] }
  0x14   :  { %v88_v35 = vld [vmem:[%s1670_s2 + $0x170] sm:$0xff]  ;;  %v86_v39 = vld [vmem:[%s1670_s2 + $0x160] sm:$0xff]  ;;  %244 = vmatpush.msra.mxu3 %v152_v34  ;;  %225 = vmatpush.msra.mxu2 %v118_v36  ;;  %v161_v19 = vld [vmem:[%s1670_s2 + $0x3b8] sm:$0xff] }
  0x15   :  { %204 = vmatpush.msra.mxu1 %v88_v35  ;;  %v116_v40 = vld [vmem:[%s1670_s2 + $0x250] sm:$0xff]  ;;  %185 = vmatpush.msra.mxu0 %v54_v37  ;;  %v114_v44 = vld [vmem:[%s1670_s2 + $0x240] sm:$0xff]  ;;  %v63_v20 = vld [vmem:[%s1670_s2 + $0xa8] sm:$0xff] }
  0x16   :  { %v52_v41 = vld [vmem:[%s1670_s2 + $0x50] sm:$0xff]  ;;  %245 = vmatpush.msra.mxu3 %v150_v38  ;;  %v50_v45 = vld [vmem:[%s1670_s2 + $0x40] sm:$0xff]  ;;  %226 = vmatpush.msra.mxu2 %v116_v40  ;;  %v97_v21 = vld [vmem:[%s1670_s2 + $0x1b8] sm:$0xff] }
  0x17   :  { %v148_v42 = vld [vmem:[%s1670_s2 + $0x350] sm:$0xff]  ;;  %205 = vmatpush.msra.mxu1 %v86_v39  ;;  %186 = vmatpush.msra.mxu0 %v52_v41  ;;  %v146_v46 = vld [vmem:[%s1670_s2 + $0x340] sm:$0xff]  ;;  %v125_v22 = vld [vmem:[%s1670_s2 + $0x298] sm:$0xff] }
  0x18   :  { %v84_v43 = vld [vmem:[%s1670_s2 + $0x150] sm:$0xff]  ;;  %v82_v47 = vld [vmem:[%s1670_s2 + $0x140] sm:$0xff]  ;;  %246 = vmatpush.msra.mxu3 %v148_v42  ;;  %227 = vmatpush.msra.mxu2 %v114_v44  ;;  %v159_v23 = vld [vmem:[%s1670_s2 + $0x3a8] sm:$0xff] }
  0x19   :  { %206 = vmatpush.msra.mxu1 %v84_v43  ;;  %v112_v48 = vld [vmem:[%s1670_s2 + $0x230] sm:$0xff]  ;;  %187 = vmatpush.msra.mxu0 %v50_v45  ;;  %v110_v52 = vld [vmem:[%s1670_s2 + $0x220] sm:$0xff]  ;;  %v61_v24 = vld [vmem:[%s1670_s2 + $0x98] sm:$0xff] }
  0x1a   :  { %v48_v49 = vld [vmem:[%s1670_s2 + $0x30] sm:$0xff]  ;;  %247 = vmatpush.msra.mxu3 %v146_v46  ;;  %v46_v53 = vld [vmem:[%s1670_s2 + $0x20] sm:$0xff]  ;;  %228 = vmatpush.msra.mxu2 %v112_v48  ;;  %v95_v25 = vld [vmem:[%s1670_s2 + $0x1a8] sm:$0xff] }
  0x1b   :  { %v144_v50 = vld [vmem:[%s1670_s2 + $0x330] sm:$0xff]  ;;  %207 = vmatpush.msra.mxu1 %v82_v47  ;;  %188 = vmatpush.msra.mxu0 %v48_v49  ;;  %v142_v54 = vld [vmem:[%s1670_s2 + $0x320] sm:$0xff]  ;;  %v123_v26 = vld [vmem:[%s1670_s2 + $0x288] sm:$0xff] }
  0x1c   :  { %v80_v51 = vld [vmem:[%s1670_s2 + $0x130] sm:$0xff]  ;;  %v78_v55 = vld [vmem:[%s1670_s2 + $0x120] sm:$0xff]  ;;  %248 = vmatpush.msra.mxu3 %v144_v50  ;;  %229 = vmatpush.msra.mxu2 %v110_v52  ;;  %v157_v27 = vld [vmem:[%s1670_s2 + $0x398] sm:$0xff] }
  0x1d   :  { %208 = vmatpush.msra.mxu1 %v80_v51  ;;  %v108_v56 = vld [vmem:[%s1670_s2 + $0x210] sm:$0xff]  ;;  %189 = vmatpush.msra.mxu0 %v46_v53  ;;  %v106_v60 = vld [vmem:[%s1670_s2 + $0x200] sm:$0xff]  ;;  %v59_v28 = vld [vmem:[%s1670_s2 + $0x88] sm:$0xff] }
  0x1e   :  { %v44_v57 = vld [vmem:[%s1670_s2 + $0x10] sm:$0xff]  ;;  %249 = vmatpush.msra.mxu3 %v142_v54  ;;  %v42_v61 = vld [vmem:[%s1670_s2] sm:$0xff]  ;;  %230 = vmatpush.msra.mxu2 %v108_v56  ;;  %v93_v29 = vld [vmem:[%s1670_s2 + $0x198] sm:$0xff] }
  0x1f   :  { %v140_v58 = vld [vmem:[%s1670_s2 + $0x310] sm:$0xff]  ;;  %209 = vmatpush.msra.mxu1 %v78_v55  ;;  %190 = vmatpush.msra.mxu0 %v44_v57  ;;  %v138_v63 = vld [vmem:[%s1670_s2 + $0x300] sm:$0xff]  ;;  %v121_v30 = vld [vmem:[%s1670_s2 + $0x278] sm:$0xff] }
  0x20   :  { %v76_v59 = vld [vmem:[%s1670_s2 + $0x110] sm:$0xff]  ;;  %250 = vmatpush.msra.mxu3 %v140_v58  ;;  %231 = vmatpush.msra.mxu2 %v106_v60  ;;  %v74_v3 = vld [vmem:[%s1670_s2 + $0x100] sm:$0xff]  ;;  %v155_v31 = vld [vmem:[%s1670_s2 + $0x388] sm:$0xff] }
  0x21   :  { %210 = vmatpush.msra.mxu1 %v76_v59  ;;  %191 = vmatpush.msra.mxu0 %v42_v61  ;;  %v57_v32 = vld [vmem:[%s1670_s2 + $0x78] sm:$0xff]  ;;  %v91_v33 = vld [vmem:[%s1670_s2 + $0x188] sm:$0xff]  ;;  %v38_v44 = vld [vmem:[%s1668_s0 + $0x10] sm:$0xff] }
  0x22   :  { %296 = vmatpush.msrb.mxu2 %v137_v62  ;;  %251 = vmatpush.msra.mxu3 %v138_v63  ;;  %v119_v34 = vld [vmem:[%s1670_s2 + $0x268] sm:$0xff]  ;;  %v153_v35 = vld [vmem:[%s1670_s2 + $0x378] sm:$0xff] }
  0x23   :  { %256 = vmatpush.msrb.mxu0 %v73_v0  ;;  %211 = vmatpush.msra.mxu1 %v74_v3  ;;  %v55_v36 = vld [vmem:[%s1670_s2 + $0x68] sm:$0xff]  ;;  %v89_v37 = vld [vmem:[%s1670_s2 + $0x178] sm:$0xff] }
  0x24   :  { %316 = vmatpush.msrb.mxu3 %v169_v1  ;;  %297 = vmatpush.msrb.mxu2 %v135_v2  ;;  %v117_v38 = vld [vmem:[%s1670_s2 + $0x258] sm:$0xff]  ;;  %v151_v39 = vld [vmem:[%s1670_s2 + $0x368] sm:$0xff] }
  0x25   :  { %257 = vmatpush.msrb.mxu0 %v71_v4  ;;  %276 = vmatpush.msrb.mxu1 %v105_v5  ;;  %v53_v40 = vld [vmem:[%s1670_s2 + $0x58] sm:$0xff]  ;;  %v87_v41 = vld [vmem:[%s1670_s2 + $0x168] sm:$0xff] }
  0x26   :  { %298 = vmatpush.msrb.mxu2 %v133_v6  ;;  %317 = vmatpush.msrb.mxu3 %v167_v7  ;;  %v115_v42 = vld [vmem:[%s1670_s2 + $0x248] sm:$0xff]  ;;  %v149_v43 = vld [vmem:[%s1670_s2 + $0x358] sm:$0xff] }
  0x27   :  { %258 = vmatpush.msrb.mxu0 %v69_v8  ;;  %277 = vmatpush.msrb.mxu1 %v103_v9  ;;  %v51_v45 = vld [vmem:[%s1670_s2 + $0x48] sm:$0xff] }
  0x28   :  { %299 = vmatpush.msrb.mxu2 %v131_v10  ;;  %318 = vmatpush.msrb.mxu3 %v165_v11 }
  0x29   :  { %259 = vmatpush.msrb.mxu0 %v67_v12  ;;  %278 = vmatpush.msrb.mxu1 %v101_v13 }
  0x2a   :  { %300 = vmatpush.msrb.mxu2 %v129_v14  ;;  %319 = vmatpush.msrb.mxu3 %v163_v15 }
  0x2b   :  { %260 = vmatpush.msrb.mxu0 %v65_v16  ;;  %279 = vmatpush.msrb.mxu1 %v99_v17 }
  0x2c   :  { %301 = vmatpush.msrb.mxu2 %v127_v18  ;;  %320 = vmatpush.msrb.mxu3 %v161_v19 }
  0x2d   :  { %261 = vmatpush.msrb.mxu0 %v63_v20  ;;  %280 = vmatpush.msrb.mxu1 %v97_v21 }
  0x2e   :  { %302 = vmatpush.msrb.mxu2 %v125_v22  ;;  %321 = vmatpush.msrb.mxu3 %v159_v23 }
  0x2f   :  { %262 = vmatpush.msrb.mxu0 %v61_v24  ;;  %281 = vmatpush.msrb.mxu1 %v95_v25 }
  0x30   :  { %303 = vmatpush.msrb.mxu2 %v123_v26  ;;  %322 = vmatpush.msrb.mxu3 %v157_v27 }
  0x31   :  { %263 = vmatpush.msrb.mxu0 %v59_v28  ;;  %282 = vmatpush.msrb.mxu1 %v93_v29 }
  0x32   :  { %304 = vmatpush.msrb.mxu2 %v121_v30  ;;  %323 = vmatpush.msrb.mxu3 %v155_v31 }
  0x33   :  { %264 = vmatpush.msrb.mxu0 %v57_v32  ;;  %283 = vmatpush.msrb.mxu1 %v91_v33 }
  0x34   :  { %305 = vmatpush.msrb.mxu2 %v119_v34  ;;  %324 = vmatpush.msrb.mxu3 %v153_v35 }
  0x35   :  { %265 = vmatpush.msrb.mxu0 %v55_v36  ;;  %284 = vmatpush.msrb.mxu1 %v89_v37 }
  0x36   :  { %306 = vmatpush.msrb.mxu2 %v117_v38  ;;  %325 = vmatpush.msrb.mxu3 %v151_v39 }
  0x37   :  { %15 = vsyncpa [#allocation3], 0  ;;  %266 = vmatpush.msrb.mxu0 %v53_v40  ;;  %285 = vmatpush.msrb.mxu1 %v87_v41  ;;  %v85_v46 = vld [vmem:[%s1670_s2 + $0x158] sm:$0xff]  ;;  %v147_v48 = vld [vmem:[%s1670_s2 + $0x348] sm:$0xff]  ;;  %vm418_vm0 = vcmask 523264   ;;  %vm648_vm1 = vcmask 130048  }
  0x38   :  { %v113_v47 = vld [vmem:[%s1670_s2 + $0x238] sm:$0xff]  ;;  %307 = vmatpush.msrb.mxu2 %v115_v42  ;;  %326 = vmatpush.msrb.mxu3 %v149_v43  ;;  %v36_v49 = vld [vmem:[%s1668_s0] sm:$0xff]  ;;  %v83_v52 = vld [vmem:[%s1670_s2 + $0x148] sm:$0xff]  ;;  %vm746_vm2 = vcmask 138240   ;;  %s779_s28 = sshll.u32 %s1678_s10, 4  ;;  %vm770_vm7 = vcmask 146432   ;;  %s780_s28 = int_to_ptr.hbm [resolvable:$true] %s779_s28 }
  0x39   :  { %232 = vmatmul.f32.vlgmr.msra.gmra.mxu2 %v38_v44  ;;  %267 = vmatpush.msrb.mxu0 %v51_v45  ;;  %v39_v50 = vld [vmem:[%s1668_s0 + $0x18] sm:$0xff]  ;;  %v111_v53 = vld [vmem:[%s1670_s2 + $0x228] sm:$0xff]  ;;  %v384_v5 = vld [vmem:[%s1671_s3 + $0x170] sm:$0xff] }
  0x3a   :  { %v49_v51 = vld [vmem:[%s1670_s2 + $0x38] sm:$0xff]  ;;  %286 = vmatpush.msrb.mxu1 %v85_v46  ;;  %308 = vmatpush.msrb.mxu2 %v113_v47  ;;  %v37_v55 = vld [vmem:[%s1668_s0 + $0x8] sm:$0xff]  ;;  %v380_v7 = vld [vmem:[%s1671_s3 + $0x150] sm:$0xff] }
  0x3b   :  { %327 = vmatpush.msrb.mxu3 %v147_v48  ;;  %192 = vmatmul.f32.vlgmr.msra.gmra.mxu0 %v36_v49  ;;  %v145_v54 = vld [vmem:[%s1670_s2 + $0x338] sm:$0xff]  ;;  %v47_v56 = vld [vmem:[%s1670_s2 + $0x28] sm:$0xff]  ;;  %v408_v9 = vld [vmem:[%s1671_s3 + $0x230] sm:$0xff] }
  0x3c   :  { %252 = vmatmul.f32.vlgmr.msra.gmra.mxu3 %v39_v50  ;;  %268 = vmatpush.msrb.mxu0 %v49_v51  ;;  %v81_v57 = vld [vmem:[%s1670_s2 + $0x138] sm:$0xff]  ;;  %v143_v59 = vld [vmem:[%s1670_s2 + $0x328] sm:$0xff]  ;;  %v404_v10 = vld [vmem:[%s1671_s3 + $0x210] sm:$0xff] }
  0x3d   :  { %287 = vmatpush.msrb.mxu1 %v83_v52  ;;  %309 = vmatpush.msrb.mxu2 %v111_v53  ;;  %v109_v58 = vld [vmem:[%s1670_s2 + $0x218] sm:$0xff]  ;;  %v79_v61 = vld [vmem:[%s1670_s2 + $0x128] sm:$0xff]  ;;  %v378_v12 = vld [vmem:[%s1671_s3 + $0x140] sm:$0xff] }
  0x3e   :  { %328 = vmatpush.msrb.mxu3 %v145_v54  ;;  %212 = vmatmul.f32.vlgmr.msra.gmra.mxu1 %v37_v55  ;;  %v45_v60 = vld [vmem:[%s1670_s2 + $0x18] sm:$0xff]  ;;  %v107_v62 = vld [vmem:[%s1670_s2 + $0x208] sm:$0xff]  ;;  %v374_v15 = vld [vmem:[%s1671_s3 + $0x120] sm:$0xff] }
  0x3f   :  { %269 = vmatpush.msrb.mxu0 %v47_v56  ;;  %288 = vmatpush.msrb.mxu1 %v81_v57  ;;  %v141_v63 = vld [vmem:[%s1670_s2 + $0x318] sm:$0xff]  ;;  %v43_v0 = vld [vmem:[%s1670_s2 + $0x8] sm:$0xff]  ;;  %v398_v17 = vld [vmem:[%s1671_s3 + $0x1e0] sm:$0xff] }
  0x40   :  { %310 = vmatpush.msrb.mxu2 %v109_v58  ;;  %329 = vmatpush.msrb.mxu3 %v143_v59  ;;  %v77_v1 = vld [vmem:[%s1670_s2 + $0x118] sm:$0xff]  ;;  %v139_v2 = vld [vmem:[%s1670_s2 + $0x308] sm:$0xff]  ;;  %v372_v19 = vld [vmem:[%s1671_s3 + $0x110] sm:$0xff] }
  0x41   :  { %270 = vmatpush.msrb.mxu0 %v45_v60  ;;  %289 = vmatpush.msrb.mxu1 %v79_v61  ;;  %v75_v3 = vld [vmem:[%s1670_s2 + $0x108] sm:$0xff]  ;;  %v381_v8 = vld [vmem:[%s1671_s3 + $0x158] sm:$0xff]  ;;  %v368_v21 = vld [vmem:[%s1671_s3 + $0xf0] sm:$0xff] }
  0x42   :  { %311 = vmatpush.msrb.mxu2 %v107_v62  ;;  %330 = vmatpush.msrb.mxu3 %v141_v63  ;;  %v383_v4 = vld [vmem:[%s1671_s3 + $0x168] sm:$0xff]  ;;  %v377_v11 = vld [vmem:[%s1671_s3 + $0x138] sm:$0xff]  ;;  %v392_v23 = vld [vmem:[%s1671_s3 + $0x1b0] sm:$0xff] }
  0x43   :  { %312 = vmatmul.f32.vlgmr.msrb.gmra.mxu2 %v38_v44  ;;  %271 = vmatpush.msrb.mxu0 %v43_v0  ;;  %v407_v6 = vld [vmem:[%s1671_s3 + $0x228] sm:$0xff]  ;;  %v405_v13 = vld [vmem:[%s1671_s3 + $0x218] sm:$0xff]  ;;  %v366_v25 = vld [vmem:[%s1671_s3 + $0xe0] sm:$0xff] }
  0x44   :  { %290 = vmatpush.msrb.mxu1 %v77_v1  ;;  %331 = vmatpush.msrb.mxu3 %v139_v2  ;;  %v401_v14 = vld [vmem:[%s1671_s3 + $0x1f8] sm:$0xff]  ;;  %v375_v16 = vld [vmem:[%s1671_s3 + $0x128] sm:$0xff]  ;;  %v362_v27 = vld [vmem:[%s1671_s3 + $0xc0] sm:$0xff] }
  0x45   :  { %272 = vmatmul.f32.vlgmr.msrb.gmra.mxu0 %v36_v49  ;;  %332 = vmatmul.f32.vlgmr.msrb.gmra.mxu3 %v39_v50  ;;  %v371_v18 = vld [vmem:[%s1671_s3 + $0x108] sm:$0xff]  ;;  %v369_v22 = vld [vmem:[%s1671_s3 + $0xf8] sm:$0xff]  ;;  %v386_v29 = vld [vmem:[%s1671_s3 + $0x180] sm:$0xff] }
  0x46   :  { %291 = vmatpush.msrb.mxu1 %v75_v3  ;;  %422 = vmatpush.msra.mxu0 %v383_v4  ;;  %v395_v20 = vld [vmem:[%s1671_s3 + $0x1c8] sm:$0xff]  ;;  %v365_v24 = vld [vmem:[%s1671_s3 + $0xd8] sm:$0xff]  ;;  %v360_v31 = vld [vmem:[%s1671_s3 + $0xb0] sm:$0xff] }
  0x47   :  { %292 = vmatmul.f32.vlgmr.msrb.gmra.mxu1 %v37_v55  ;;  %462 = vmatpush.msra.mxu2 %v384_v5  ;;  %v389_v26 = vld [vmem:[%s1671_s3 + $0x198] sm:$0xff]  ;;  %v363_v28 = vld [vmem:[%s1671_s3 + $0xc8] sm:$0xff]  ;;  %v356_v33 = vld [vmem:[%s1671_s3 + $0x90] sm:$0xff] }
  0x48   :  { %450 = vmatpush.msra.mxu1 %v407_v6  ;;  %423 = vmatpush.msra.mxu0 %v380_v7  ;;  %v359_v30 = vld [vmem:[%s1671_s3 + $0xa8] sm:$0xff]  ;;  %v385_v32 = vld [vmem:[%s1671_s3 + $0x178] sm:$0xff]  ;;  %v382_v35 = vld [vmem:[%s1671_s3 + $0x160] sm:$0xff] }
  0x49   :  { %463 = vmatpush.msra.mxu2 %v381_v8  ;;  %490 = vmatpush.msra.mxu3 %v408_v9  ;;  %v357_v34 = vld [vmem:[%s1671_s3 + $0x98] sm:$0xff]  ;;  %v354_v37 = vld [vmem:[%s1671_s3 + $0x80] sm:$0xff]  ;;  %v379_v38 = vld [vmem:[%s1671_s3 + $0x148] sm:$0xff] }
  0x4a   :  { %451 = vmatpush.msra.mxu1 %v404_v10  ;;  %424 = vmatpush.msra.mxu0 %v377_v11  ;;  %v353_v36 = vld [vmem:[%s1671_s3 + $0x78] sm:$0xff]  ;;  %v402_v39 = vld [vmem:[%s1671_s3 + $0x200] sm:$0xff]  ;;  %v351_v41 = vld [vmem:[%s1671_s3 + $0x68] sm:$0xff] }
  0x4b   :  { %464 = vmatpush.msra.mxu2 %v378_v12  ;;  %491 = vmatpush.msra.mxu3 %v405_v13  ;;  %v350_v40 = vld [vmem:[%s1671_s3 + $0x60] sm:$0xff]  ;;  %v376_v42 = vld [vmem:[%s1671_s3 + $0x130] sm:$0xff]  ;;  %v399_v43 = vld [vmem:[%s1671_s3 + $0x1e8] sm:$0xff] }
  0x4c   :  { %452 = vmatpush.msra.mxu1 %v401_v14  ;;  %425 = vmatpush.msra.mxu0 %v374_v15  ;;  %v347_v44 = vld [vmem:[%s1671_s3 + $0x48] sm:$0xff]  ;;  %v348_v45 = vld [vmem:[%s1671_s3 + $0x50] sm:$0xff]  ;;  %v373_v46 = vld [vmem:[%s1671_s3 + $0x118] sm:$0xff] }
  0x4d   :  { %465 = vmatpush.msra.mxu2 %v375_v16  ;;  %492 = vmatpush.msra.mxu3 %v402_v39  ;;  %v396_v47 = vld [vmem:[%s1671_s3 + $0x1d0] sm:$0xff]  ;;  %v345_v49 = vld [vmem:[%s1671_s3 + $0x38] sm:$0xff]  ;;  %v370_v50 = vld [vmem:[%s1671_s3 + $0x100] sm:$0xff] }
  0x4e   :  { %453 = vmatpush.msra.mxu1 %v398_v17  ;;  %426 = vmatpush.msra.mxu0 %v371_v18  ;;  %v344_v48 = vld [vmem:[%s1671_s3 + $0x30] sm:$0xff]  ;;  %v393_v51 = vld [vmem:[%s1671_s3 + $0x1b8] sm:$0xff]  ;;  %v342_v53 = vld [vmem:[%s1671_s3 + $0x20] sm:$0xff] }
  0x4f   :  { %466 = vmatpush.msra.mxu2 %v372_v19  ;;  %493 = vmatpush.msra.mxu3 %v399_v43  ;;  %v341_v52 = vld [vmem:[%s1671_s3 + $0x18] sm:$0xff]  ;;  %v367_v54 = vld [vmem:[%s1671_s3 + $0xe8] sm:$0xff]  ;;  %v390_v55 = vld [vmem:[%s1671_s3 + $0x1a0] sm:$0xff] }
  0x50   :  { %454 = vmatpush.msra.mxu1 %v395_v20  ;;  %427 = vmatpush.msra.mxu0 %v368_v21  ;;  %v338_v56 = vld [vmem:[%s1671_s3] sm:$0xff]  ;;  %v339_v57 = vld [vmem:[%s1671_s3 + $0x8] sm:$0xff]  ;;  %v364_v58 = vld [vmem:[%s1671_s3 + $0xd0] sm:$0xff] }
  0x51   :  { %467 = vmatpush.msra.mxu2 %v369_v22  ;;  %494 = vmatpush.msra.mxu3 %v396_v47  ;;  %v387_v59 = vld [vmem:[%s1671_s3 + $0x188] sm:$0xff]  ;;  %v361_v60 = vld [vmem:[%s1671_s3 + $0xb8] sm:$0xff]  ;;  %v358_v62 = vld [vmem:[%s1671_s3 + $0xa0] sm:$0xff] }
  0x52   :  { %455 = vmatpush.msra.mxu1 %v392_v23  ;;  %428 = vmatpush.msra.mxu0 %v365_v24  ;;  %v409_v61 = vld [vmem:[%s1671_s3 + $0x238] sm:$0xff]  ;;  %v406_v63 = vld [vmem:[%s1671_s3 + $0x220] sm:$0xff]  ;;  %v355_v0 = vld [vmem:[%s1671_s3 + $0x88] sm:$0xff] }
  0x53   :  { %468 = vmatpush.msra.mxu2 %v366_v25  ;;  %495 = vmatpush.msra.mxu3 %v393_v51  ;;  %v403_v1 = vld [vmem:[%s1671_s3 + $0x208] sm:$0xff]  ;;  %v352_v2 = vld [vmem:[%s1671_s3 + $0x70] sm:$0xff]  ;;  %v349_v4 = vld [vmem:[%s1671_s3 + $0x58] sm:$0xff] }
  0x54   :  { %456 = vmatpush.msra.mxu1 %v389_v26  ;;  %429 = vmatpush.msra.mxu0 %v362_v27  ;;  %v400_v3 = vld [vmem:[%s1671_s3 + $0x1f0] sm:$0xff]  ;;  %v397_v5 = vld [vmem:[%s1671_s3 + $0x1d8] sm:$0xff]  ;;  %v346_v6 = vld [vmem:[%s1671_s3 + $0x40] sm:$0xff] }
  0x55   :  { %469 = vmatpush.msra.mxu2 %v363_v28  ;;  %496 = vmatpush.msra.mxu3 %v390_v55  ;;  %v394_v7 = vld [vmem:[%s1671_s3 + $0x1c0] sm:$0xff]  ;;  %v391_v8 = vld [vmem:[%s1671_s3 + $0x1a8] sm:$0xff]  ;;  %v388_v10 = vld [vmem:[%s1671_s3 + $0x190] sm:$0xff] }
  0x56   :  { %457 = vmatpush.msra.mxu1 %v386_v29  ;;  %430 = vmatpush.msra.mxu0 %v359_v30  ;;  %v343_v9 = vld [vmem:[%s1671_s3 + $0x28] sm:$0xff]  ;;  %v170_v11 = vld [vmem:[%s1676_s8] sm:$0x3]  ;;  %v340_v12 = vld [vmem:[%s1671_s3 + $0x10] sm:$0xff] }
  0x57   :  { %470 = vmatpush.msra.mxu2 %v360_v31  ;;  %497 = vmatpush.msra.mxu3 %v387_v59  ;;  %v172_v13 = vperm.slane %v170_v11, 0  ;;  %v560_v14 = vld [vmem:[%s1672_s4 + $0x78] sm:$0xff]  ;;  %v559_v15 = vld [vmem:[%s1672_s4 + $0x70] sm:$0xff]  ;;  %v558_v17 = vld [vmem:[%s1672_s4 + $0x68] sm:$0xff] }
  0x58   :  { %502 = vmatpush.msrb.mxu1 %v385_v32  ;;  %431 = vmatpush.msra.mxu0 %v356_v33  ;;  %v576_v16 = vld [vmem:[%s1672_s4 + $0xf8] sm:$0xff]  ;;  %v575_v18 = vld [vmem:[%s1672_s4 + $0xf0] sm:$0xff]  ;;  %v574_v20 = vld [vmem:[%s1672_s4 + $0xe8] sm:$0xff]  ;;  %v173_v33 = vperm.slane %v170_v11, 1 }
  0x59   :  { %471 = vmatpush.msra.mxu2 %v357_v34  ;;  %530 = vmatpush.msrb.mxu3 %v409_v61  ;;  %v557_v22 = vld [vmem:[%s1672_s4 + $0x60] sm:$0xff]  ;;  %v556_v25 = vld [vmem:[%s1672_s4 + $0x58] sm:$0xff]  ;;  %v555_v29 = vld [vmem:[%s1672_s4 + $0x50] sm:$0xff] }
  0x5a   :  { %503 = vmatpush.msrb.mxu1 %v382_v35  ;;  %432 = vmatpush.msra.mxu0 %v353_v36  ;;  %v573_v23 = vld [vmem:[%s1672_s4 + $0xe0] sm:$0xff]  ;;  %v572_v28 = vld [vmem:[%s1672_s4 + $0xd8] sm:$0xff]  ;;  %v571_v31 = vld [vmem:[%s1672_s4 + $0xd0] sm:$0xff] }
  0x5b   :  { %472 = vmatpush.msra.mxu2 %v354_v37  ;;  %531 = vmatpush.msrb.mxu3 %v406_v63  ;;  %v554_v34 = vld [vmem:[%s1672_s4 + $0x48] sm:$0xff]  ;;  %v569_v51 = vld [vmem:[%s1672_s4 + $0xc0] sm:$0xff]  ;;  %v567_v55 = vld [vmem:[%s1672_s4 + $0xb0] sm:$0xff] }
  0x5c   :  { %504 = vmatpush.msrb.mxu1 %v379_v38  ;;  %433 = vmatpush.msra.mxu0 %v350_v40  ;;  %v553_v38 = vld [vmem:[%s1672_s4 + $0x40] sm:$0xff]  ;;  %v564_v61 = vld [vmem:[%s1672_s4 + $0x98] sm:$0xff]  ;;  %v563_v63 = vld [vmem:[%s1672_s4 + $0x90] sm:$0xff] }
  0x5d   :  { %473 = vmatpush.msra.mxu2 %v351_v41  ;;  %532 = vmatpush.msrb.mxu3 %v403_v1  ;;  %v552_v41 = vld [vmem:[%s1672_s4 + $0x38] sm:$0xff]  ;;  %v565_v59 = vld [vmem:[%s1672_s4 + $0xa0] sm:$0xff]  ;;  %v562_v1 = vld [vmem:[%s1672_s4 + $0x88] sm:$0xff] }
  0x5e   :  { %505 = vmatpush.msrb.mxu1 %v376_v42  ;;  %434 = vmatpush.msra.mxu0 %v347_v44 }
  0x5f   :  { %474 = vmatpush.msra.mxu2 %v348_v45  ;;  %533 = vmatpush.msrb.mxu3 %v400_v3  ;;  %v561_v3 = vld [vmem:[%s1672_s4 + $0x80] sm:$0xff] }
  0x60   :  { %506 = vmatpush.msrb.mxu1 %v373_v46  ;;  %435 = vmatpush.msra.mxu0 %v344_v48  ;;  %v551_v48 = vld [vmem:[%s1672_s4 + $0x30] sm:$0xff] }
  0x61   :  { %475 = vmatpush.msra.mxu2 %v345_v49  ;;  %534 = vmatpush.msrb.mxu3 %v397_v5  ;;  %v570_v49 = vld [vmem:[%s1672_s4 + $0xc8] sm:$0xff]  ;;  %v580_v5 = vld [vmem:[%s1672_s4 + $0x118] sm:$0xff] }
  0x62   :  { %507 = vmatpush.msrb.mxu1 %v370_v50  ;;  %436 = vmatpush.msra.mxu0 %v341_v52  ;;  %v550_v50 = vld [vmem:[%s1672_s4 + $0x28] sm:$0xff]  ;;  %v549_v52 = vld [vmem:[%s1672_s4 + $0x20] sm:$0xff] }
  0x63   :  { %476 = vmatpush.msra.mxu2 %v342_v53  ;;  %535 = vmatpush.msrb.mxu3 %v394_v7  ;;  %v568_v53 = vld [vmem:[%s1672_s4 + $0xb8] sm:$0xff]  ;;  %v578_v7 = vld [vmem:[%s1672_s4 + $0x108] sm:$0xff] }
  0x64   :  { %508 = vmatpush.msrb.mxu1 %v367_v54  ;;  %437 = vmatpush.msra.mxu0 %v338_v56  ;;  %v548_v54 = vld [vmem:[%s1672_s4 + $0x18] sm:$0xff]  ;;  %v547_v56 = vld [vmem:[%s1672_s4 + $0x10] sm:$0xff] }
  0x65   :  { %477 = vmatpush.msra.mxu2 %v339_v57  ;;  %536 = vmatpush.msrb.mxu3 %v391_v8  ;;  %v566_v57 = vld [vmem:[%s1672_s4 + $0xa8] sm:$0xff]  ;;  %v577_v8 = vld [vmem:[%s1672_s4 + $0x100] sm:$0xff] }
  0x66   :  { %509 = vmatpush.msrb.mxu1 %v364_v58  ;;  %588 = vmatpush.msrb.mxu0 %v560_v14  ;;  %v546_v58 = vld [vmem:[%s1672_s4 + $0x8] sm:$0xff] }
  0x67   :  { %537 = vmatpush.msrb.mxu3 %v388_v10  ;;  %608 = vmatpush.msrb.mxu2 %v576_v16 }
  0x68   :  { %510 = vmatpush.msrb.mxu1 %v361_v60  ;;  %589 = vmatpush.msrb.mxu0 %v559_v15  ;;  %v545_v60 = vld [vmem:[%s1672_s4] sm:$0xff] }
  0x69   :  { %609 = vmatpush.msrb.mxu2 %v575_v18 }
  0x6a   :  { %511 = vmatpush.msrb.mxu1 %v358_v62  ;;  %590 = vmatpush.msrb.mxu0 %v558_v17  ;;  %v584_v62 = vld [vmem:[%s1672_s4 + $0x138] sm:$0xff] }
  0x6b   :  { %610 = vmatpush.msrb.mxu2 %v574_v20 }
  0x6c   :  { %512 = vmatpush.msrb.mxu1 %v355_v0  ;;  %591 = vmatpush.msrb.mxu0 %v557_v22  ;;  %v583_v0 = vld [vmem:[%s1672_s4 + $0x130] sm:$0xff] }
  0x6d   :  { %611 = vmatpush.msrb.mxu2 %v573_v23 }
  0x6e   :  { %513 = vmatpush.msrb.mxu1 %v352_v2  ;;  %592 = vmatpush.msrb.mxu0 %v556_v25  ;;  %v582_v2 = vld [vmem:[%s1672_s4 + $0x128] sm:$0xff] }
  0x6f   :  { %612 = vmatpush.msrb.mxu2 %v572_v28  ;;  %v40_v28 = vld [vmem:[%s1669_s1] sm:$0xff] }
  0x70   :  { %514 = vmatpush.msrb.mxu1 %v349_v4  ;;  %593 = vmatpush.msrb.mxu0 %v555_v29  ;;  %v581_v4 = vld [vmem:[%s1672_s4 + $0x120] sm:$0xff] }
  0x71   :  { %613 = vmatpush.msrb.mxu2 %v571_v31 }
  0x72   :  { %515 = vmatpush.msrb.mxu1 %v346_v6  ;;  %594 = vmatpush.msrb.mxu0 %v554_v34  ;;  %v579_v6 = vld [vmem:[%s1672_s4 + $0x110] sm:$0xff] }
  0x73   :  { %614 = vmatpush.msrb.mxu2 %v570_v49 }
  0x74   :  { %516 = vmatpush.msrb.mxu1 %v343_v9  ;;  %595 = vmatpush.msrb.mxu0 %v553_v38  ;;  %v410_v9 = vld [vmem:[%s1677_s9] sm:$0x7] }
  0x75   :  { %615 = vmatpush.msrb.mxu2 %v569_v51  ;;  %v412_v10 = vperm.slane %v410_v9, 0  ;;  %v413_v14 = vperm.slane %v410_v9, 1  ;;  %v414_v22 = vperm.slane %v410_v9, 2 }
  0x76   :  { %517 = vmatpush.msrb.mxu1 %v340_v12  ;;  %596 = vmatpush.msrb.mxu0 %v552_v41 }
  0x77   :  { %616 = vmatpush.msrb.mxu2 %v568_v53 }
  0x78   :  { %597 = vmatpush.msrb.mxu0 %v551_v48 }
  0x79   :  { %617 = vmatpush.msrb.mxu2 %v567_v55 }
  0x7a   :  { %598 = vmatpush.msrb.mxu0 %v550_v50 }
  0x7b   :  { %618 = vmatpush.msrb.mxu2 %v566_v57 }
  0x7c   :  { %599 = vmatpush.msrb.mxu0 %v549_v52 }
  0x7d   :  { %619 = vmatpush.msrb.mxu2 %v565_v59 }
  0x7e   :  { %600 = vmatpush.msrb.mxu0 %v548_v54  ;;  %v670_v54 = vld [vmem:[%s1674_s6] sm:$0x3] }
  0x7f   :  { %620 = vmatpush.msrb.mxu2 %v564_v61  ;;  %v673_v55 = vperm.slane %v670_v54, 1 }
  0x80   :  { %601 = vmatpush.msrb.mxu0 %v547_v56  ;;  %v721_v56 = vld [vmem:[%s1675_s7] sm:$0x3] }
  0x81   :  { %621 = vmatpush.msrb.mxu2 %v563_v63 }
  0x82   :  { %602 = vmatpush.msrb.mxu0 %v546_v58  ;;  %v724_v58 = vperm.slane %v721_v56, 1 }
  0x83   :  { %622 = vmatpush.msrb.mxu2 %v562_v1 }
  0x84   :  { %603 = vmatpush.msrb.mxu0 %v545_v60 }
  0x85   :  { %623 = vmatpush.msrb.mxu2 %v561_v3 }
  0xb8   :  { %v193_v19 = vpop.f32.mrf.mxu0 }
  0xb9   :  { %v194_v21 = vadd.f32 %v193_v19, %v172_v13 }
  0xbb   :  { %v213_v24 = vpop.f32.mrf.mxu1 }
  0xbc   :  { %v214_v26 = vadd.f32 %v213_v24, %v194_v21  ;;  %v233_v27 = vpop.f32.mrf.mxu2 }
  0xbe   :  { %v234_v30 = vadd.f32 %v233_v27, %v214_v26 }
  0xbf   :  { %v253_v32 = vpop.f32.mrf.mxu3 }
  0xc0   :  { %v254_v35 = vadd.f32 %v253_v32, %v234_v30 }
  0xc2   :  { %v336_v36 = vmax.f32 %v254_v35, 0.0  ;;  %v273_v37 = vpop.f32.mrf.mxu0 }
  0xc3   :  { %v274_v39 = vadd.f32 %v273_v37, %v173_v33 }
  0xc4   :  { %v293_v40 = vpop.f32.mrf.mxu1  ;;  %438 = vmatmul.f32.vlgmr.msra.gmra.mxu0 %v336_v36  ;;  %478 = vmatmul.f32.vlgmr.msra.gmra.mxu2 %v336_v36 }
  0xc5   :  { %v294_v42 = vadd.f32 %v293_v40, %v274_v39 }
  0xc6   :  { %v313_v43 = vpop.f32.mrf.mxu2 }
  0xc7   :  { %v314_v44 = vadd.f32 %v313_v43, %v294_v42  ;;  %v669_v42 = vld [vmem:[%s1673_s5 + $0x18] sm:$0xff]  ;;  %v668_v43 = vld [vmem:[%s1673_s5 + $0x10] sm:$0xff] }
  0xc8   :  { %v333_v45 = vpop.f32.mrf.mxu3 }
  0xc9   :  { %v334_v46 = vadd.f32 %v333_v45, %v314_v44  ;;  %v667_v44 = vld [vmem:[%s1673_s5 + $0x8] sm:$0xff]  ;;  %v666_v45 = vld [vmem:[%s1673_s5] sm:$0xff] }
  0xcb   :  { %v337_v47 = vmax.f32 %v334_v46, 0.0 }
  0xcd   :  { %788 = vmatmul.msk.f32.vlgmr.msra.gmra.mxu1 %vm418_vm0, %v337_v47  ;;  %789 = vmatmul.msk.f32.vlgmr.msra.gmra.mxu3 %vm418_vm0, %v337_v47 }
  0xce   :  { %636 = vmatpush.msra.mxu3 %v584_v62  ;;  %695 = vmatpush.msra.mxu1 %v668_v43 }
  0xd0   :  { %637 = vmatpush.msra.mxu3 %v583_v0  ;;  %696 = vmatpush.msra.mxu1 %v666_v45  ;;  %v672_v0 = vperm.slane %v670_v54, 0 }
  0xd2   :  { %638 = vmatpush.msra.mxu3 %v582_v2 }
  0xd4   :  { %639 = vmatpush.msra.mxu3 %v581_v4 }
  0xd5   :  { %518 = vmatmul.f32.vlgmr.msrb.gmra.mxu1 %v336_v36  ;;  %790 = vmatmul.msk.f32.vlgmr.msrb.gmra.mxu3 %vm418_vm0, %v337_v47 }
  0xd6   :  { %640 = vmatpush.msra.mxu3 %v580_v5  ;;  %v723_v5 = vperm.slane %v721_v56, 0 }
  0xd8   :  { %641 = vmatpush.msra.mxu3 %v579_v6 }
  0xda   :  { %642 = vmatpush.msra.mxu3 %v578_v7  ;;  %v41_v7 = vld [vmem:[%s1669_s1 + $0x8] sm:$0xff]  ;;  %s836_s1 = smov [#allocation2]  }
  0xdb   :  { %s777_s7 = sshll.u32 %s836_s1, 4  ;;  %s778_s7 = int_to_ptr.vmem [resolvable:$true] %s777_s7 }
  0xdc   :  { %643 = vmatpush.msra.mxu3 %v577_v8 }
  0xde   :  { %715 = vmatpush.msrb.mxu3 %v669_v42 }
  0xe0   :  { %716 = vmatpush.msrb.mxu3 %v667_v44 }
 0x141   :  { %v439_v11 = vpop.f32.mrf.mxu0 }
 0x142   :  { %v440_v12 = vadd.f32 %v439_v11, %v412_v10 }
 0x147   :  { %v479_v16 = vpop.f32.mrf.mxu2 }
 0x148   :  { %v480_v18 = vadd.f32 %v479_v16, %v413_v14  ;;  %v736_v14 = vmul.f32 -0.5, %v41_v7 }
 0x14a   :  { %v459_v13 = vpop.f32.mrf.mxu1 }
 0x14b   :  { %v460_v15 = vadd.f32 %v459_v13, %v440_v12 }
 0x14d   :  { %v542_v17 = vmax.f32 %v460_v15, 0.0 }
 0x14f   :  { %604 = vmatmul.f32.vlgmr.msrb.gmra.mxu0 %v542_v17 }
 0x150   :  { %v499_v19 = vpop.f32.mrf.mxu3 }
 0x151   :  { %v500_v20 = vadd.f32 %v499_v19, %v480_v18  ;;  %v737_v18 = vmul.f32 %v736_v14, %v41_v7 }
 0x152   :  { %v519_v23 = vpop.f32.mrf.mxu1 }
 0x153   :  { %v543_v21 = vmax.f32 %v500_v20, 0.0  ;;  %v520_v24 = vadd.f32 %v519_v23, %v414_v22 }
 0x155   :  { %624 = vmatmul.f32.vlgmr.msrb.gmra.mxu2 %v543_v21 }
 0x158   :  { %v539_v25 = vpop.f32.mrf.mxu3 }
 0x159   :  { %v540_v26 = vadd.f32 %v539_v25, %v520_v24 }
 0x15b   :  { %v544_v27 = vmax.f32 %v540_v26, 0.0 }
 0x15d   :  { %791 = vmatmul.msk.f32.vlgmr.msra.gmra.mxu3 %vm418_vm0, %v544_v27 }
 0x1cc   :  { %v605_v29 = vpop.f32.mrf.mxu0 }
 0x1cd   :  { %v606_v31 = vadd.f32 %v605_v29, %v40_v28 }
 0x1d8   :  { %v625_v30 = vpop.f32.mrf.mxu2 }
 0x1d9   :  { %v626_v32 = vadd.f32 %v625_v30, %v606_v31 }
 0x1e0   :  { %v645_v33 = vpop.f32.mrf.mxu3 }
 0x1e1   :  { %v646_v34 = vadd.f32 %v645_v33, %v626_v32 }
 0x1e3   :  { %v649_v35 = vsel %vm648_vm1, %v646_v34, -inf }
 0x1e4   :  { %650 = vmax.xlane.f32.xlu0 %v649_v35 }
 0x257   :  { %v651_v36 = vpop.xlane.xlu0 %650 }
 0x258   :  { %v652_v37 = vmax.f32 %v651_v36, 0.0 }
 0x25a   :  { %v653_v38 = vsub.f32 %v646_v34, %v652_v37  ;;  %v656_v46 = vsub.f32 0.0, %v652_v37 }
 0x25c   :  { %v654_v39 = vmul.f32 1.442695, %v653_v38  ;;  %v657_v47 = vmul.f32 1.442695, %v656_v46 }
 0x25e   :  { %796 = vpow2.f32 %v654_v39 }
 0x25f   :  { %798 = vpow2.f32 %v657_v47 }
 0x264   :  { %v797_v40 = vpop.eup %796 }
 0x265   :  { %v659_v41 = vsel %vm648_vm1, %v797_v40, 0.0  ;;  %v799_v48 = vpop.eup %798 }
 0x266   :  { %660 = vadd.xlane.f32.xlu0 %v659_v41 }
 0x2d9   :  { %v661_v49 = vpop.xlane.xlu0 %660 }
 0x2da   :  { %v662_v50 = vadd.f32 %v799_v48, %v661_v49 }
 0x2dc   :  { %800 = vrcp.f32 %v662_v50 }
 0x2e2   :  { %v801_v51 = vpop.eup %800 }
 0x2e3   :  { %v664_v52 = vmul.f32 %v801_v51, %v797_v40  ;;  %v665_v53 = vmul.f32 %v801_v51, %v799_v48 }
 0x2e5   :  { %792 = vmatmul.msk.f32.vlgmr.msra.gmra.mxu1 %vm648_vm1, %v664_v52  ;;  %793 = vmatmul.msk.f32.vlgmr.msrb.gmra.mxu3 %vm648_vm1, %v664_v52  ;;  %v677_v57 = vmul.f32 %v673_v55, %v665_v53  ;;  %v676_v3 = vmul.f32 %v672_v0, %v665_v53 }
 0x362   :  { %v698_v2 = vpop.f32.mrf.mxu1 }
 0x363   :  { %v699_v4 = vadd.f32 %v698_v2, %v676_v3 }
 0x365   :  { %v727_v8 = vadd.f32 %v723_v5, %v699_v4 }
 0x368   :  { %v718_v59 = vpop.f32.mrf.mxu3 }
 0x369   :  { %v719_v60 = vadd.f32 %v718_v59, %v677_v57 }
 0x36b   :  { %v728_v61 = vadd.f32 %v724_v58, %v719_v60 }
 0x36d   :  { %v729_v62 = vmax.f32 %v728_v61, -20.0 }
 0x36f   :  { %v730_v63 = vmin.f32 %v729_v62, 2.0 }
 0x371   :  { %v731_v1 = vmul.f32 1.442695, %v730_v63  ;;  %v738_v19 = vsub.f32 %v737_v18, %v730_v63 }
 0x373   :  { %802 = vpow2.f32 %v731_v1  ;;  %v794_v21 = vadd.f32 -0.9189385, %v738_v19 }
 0x379   :  { %v803_v6 = vpop.eup %802 }
 0x37a   :  { %v733_v9 = vmul.f32 %v803_v6, %v41_v7 }
 0x37c   :  { %v734_v10 = vadd.f32 %v733_v9, %v727_v8 }
 0x37e   :  { %804 = vtanh.f32 %v734_v10 }
 0x384   :  { %v805_v11 = vpop.eup %804 }
 0x385   :  { %v750_v12 = vadd.f32 1.0, %v805_v11  ;;  %v740_v13 = vmul.f32 %v805_v11, %v805_v11 }
 0x387   :  { %v751_v15 = vsel %vm746_vm2, %v750_v12, 0.0  ;;  %v741_v16 = vsub.f32 1.0, %v740_v13 }
 0x388   :  { %752 = vadd.xlane.f32.xlu1 %v751_v15 }
 0x389   :  { %v742_v17 = vadd.f32 1e-06, %v741_v16 }
 0x38b   :  { %806 = vlog2.f32 %v742_v17 }
 0x391   :  { %v807_v20 = vpop.eup %806 }
 0x392   :  { %v744_v22 = vmul.f32 0.6931472, %v807_v20 }
 0x394   :  { %v745_v23 = vsub.f32 %v794_v21, %v744_v22 }
 0x396   :  { %v747_v24 = vsel %vm746_vm2, %v745_v23, 0.0 }
 0x397   :  { %748 = vadd.xlane.f32.xlu1 %v747_v24 }
 0x3fb   :  { %v753_v25 = vpop.xlane.xlu1 %752 }
 0x3fc   :  { %808 = vrcp.f32 %v753_v25  ;;  %v765_v29 = vand.u32 2147483648, %v753_v25  ;;  %v763_v31 = vand.u32 2147483647, %v753_v25  ;;  %vm759_vm4 = vweird.f32 %v753_v25 }
 0x3fe   :  { %v766_v33 = vor.u32 1.1754944e-38, %v765_v29  ;;  %vm764_vm6 = vcmp.eq.f32.partialorder %v763_v31, 8.507059e+37 }
 0x402   :  { %v809_v26 = vpop.eup %808 }
 0x403   :  { %v755_v27 = vmul.f32 %v809_v26, %v753_v25  ;;  %vm760_vm3 = vweird.f32 %v809_v26 }
 0x404   :  { %vm761_vm5 = vmor %vm759_vm4, %vm760_vm3 }
 0x405   :  { %v756_v28 = vsub.f32 1.0, %v755_v27 }
 0x407   :  { %v757_v30 = vmul.f32 %v809_v26, %v756_v28 }
 0x409   :  { %v758_v32 = vadd.f32 %v809_v26, %v757_v30 }
 0x40a   :  { %v749_v37 = vpop.xlane.xlu1 %748 }
 0x40b   :  { %v762_v34 = vsel %vm761_vm5, %v809_v26, %v758_v32 }
 0x40c   :  { %v767_v35 = vsel %vm764_vm6, %v766_v33, %v762_v34 }
 0x40d   :  { %v768_v36 = vmul.f32 %v767_v35, %v750_v12 }
 0x40f   :  { %v769_v38 = vsel %vm746_vm2, %v768_v36, %v749_v37 }
 0x410   :  { %771 = vst.msk [vmem:[#allocation2] sm:$0xff] %vm770_vm7, %v769_v38 }
 0x411   :  { %782 = dma.vmem_to_hbm [thread:$0]  %s778_s7, 128, %s780_s28, [#allocation3]  }
 0x412   :  { %834 = dma.done.wait [#allocation3], 128  }
 0x413   :  { %835 = vsyncadd [#allocation3], 4294967168 }
 0x414   :  { %787 = vsyncpa [#allocation3], 1 }

</bundles_post_ra>
